<compile_context>
chip_gen: v7x
topology: tpu7x:2x2x1
jax: 0.10.0
libtpu: 0.0.40
codegen_flags: <defaults>
</compile_context>

<pallas_src>
import jax
import jax.numpy as jnp
from jax.experimental import pallas as pl
from jax.experimental.pallas import tpu as pltpu


PACK = 8  # batch rows packed per lane-dense row: PACK * D_out = 8 * 16 = 128 lanes


def _round_up(n, m):
    return ((n + m - 1) // m) * m


def multi_module_kernel(x_ref, w1_ref, b1_ref, w2_ref, b2_ref, o_ref):
    # x_ref: (tg, PACK*D_in) f32. Cast to bf16 in-kernel (VPU) so the HBM
    # stream for x is a single dense f32 read (no separate XLA convert pass).
    xb = x_ref[...].astype(jnp.bfloat16)
    # Layer 0: nn.Linear(32, 64) applied to all PACK packed rows at once via
    # the block-diagonal weight; bf16 MXU operands, f32 accumulation.
    h = jnp.dot(xb, w1_ref[...], preferred_element_type=jnp.float32)
    h = h + b1_ref[...]                       # f32 bias add (broadcast over rows)
    # Layer 1: nn.ReLU() — elementwise, so the packed layout never mixes rows.
    h = jnp.maximum(h, 0.0)
    # Layer 2: nn.Linear(64, 16), block-diagonal -> result is already the
    # lane-dense packed output (tg, 128); bf16 MXU operands, f32 accumulation.
    o = jnp.dot(h.astype(jnp.bfloat16), w2_ref[...],
                preferred_element_type=jnp.float32)
    o = o + b2_ref[...]
    # Layer 3: torch.tanh (one-arg function in module_list) — f32 on the EUP.
    o_ref[...] = jnp.tanh(o).astype(o_ref.dtype)


def multi_module(x, w1, b1, w2, b2, *, tile_rows=8192, out_dtype=jnp.float32):
    """y = tanh(relu(x @ w1 + b1) @ w2 + b2), lane-dense batch-packed Pallas kernel.

    x:  [B, D_in] float32
    w1: [D_in, H] float32      b1: [1, H] (or [H]) float32
    w2: [H, D_out] float32     b2: [1, D_out] (or [D_out]) float32
    """
    B, D_in = x.shape
    H = w1.shape[1]
    D_out = w2.shape[1]
    assert PACK * D_out == 128, "packing factor chosen so PACK*D_out fills 128 lanes"

    # Pack PACK consecutive batch rows into one lane-dense row. The reshape of a
    # contiguous row-major array is free; the pad only triggers for ragged
    # batches (<= PACK-1 extra rows) — no tile-sized padding pass anymore.
    Bp = _round_up(B, PACK)
    if Bp != B:
        x = jnp.pad(x, ((0, Bp - B), (0, 0)))
    S = Bp // PACK
    xd = x.reshape(S, PACK * D_in)                       # (S, 256) f32, free view

    # Block-diagonal packed weights: kron(I_PACK, W) puts W on the diagonal, so
    # packed rows never mix. Tiny tensors, built once per call (constant-folded
    # under jit). Weights in bf16 for the MXU; biases stay f32.
    eye = jnp.eye(PACK, dtype=w1.dtype)
    w1p = jnp.kron(eye, w1).astype(jnp.bfloat16)          # (PACK*D_in, PACK*H) = (256, 512)
    w2p = jnp.kron(eye, w2).astype(jnp.bfloat16)          # (PACK*H, PACK*D_out) = (512, 128)
    b1p = jnp.tile(b1.reshape(1, H), (1, PACK)).astype(jnp.float32)       # (1, 512)
    b2p = jnp.tile(b2.reshape(1, D_out), (1, PACK)).astype(jnp.float32)   # (1, 128)

    # Packed-row tile. tile_rows=8192 original rows -> tg=1024 packed rows:
    # ~1.5 MiB HBM traffic per grid step (>> 0.35 us/step overhead) and ~10 MiB
    # of VMEM. tg kept a multiple of 16 (bf16 output sublane tiling). If the
    # tile would swallow the whole batch, split into >= 2 steps so the
    # "parallel" axis can shard across v7x's two TensorCores.
    tg = max(16, _round_up(tile_rows, 16 * PACK) // PACK)
    tg = min(tg, _round_up(S, 16))
    if S > 16 and pl.cdiv(S, tg) < 2:
        tg = _round_up(pl.cdiv(S, 2), 16)

    grid = (pl.cdiv(S, tg),)   # masked edge block handles ragged S; rows beyond
                               # S are never stored, OOB input rows are discarded.

    out = pl.pallas_call(
        multi_module_kernel,
        out_shape=jax.ShapeDtypeStruct((S, PACK * D_out), out_dtype),
        grid=grid,
        in_specs=[
            # x: tiled over the packed-batch axis, lane-dense (256 = 2*128 lanes).
            pl.BlockSpec((tg, PACK * D_in), lambda i: (i, 0)),
            # Weights / biases: constant blocks -> stay resident in VMEM.
            pl.BlockSpec((PACK * D_in, PACK * H), lambda i: (0, 0)),
            pl.BlockSpec((1, PACK * H), lambda i: (0, 0)),
            pl.BlockSpec((PACK * H, PACK * D_out), lambda i: (0, 0)),
            pl.BlockSpec((1, PACK * D_out), lambda i: (0, 0)),
        ],
        # Output: lane-dense (tg, 128) blocks -> unmasked vst, dense writeback DMA.
        out_specs=pl.BlockSpec((tg, PACK * D_out), lambda i: (i, 0)),
        compiler_params=pltpu.CompilerParams(
            # Independent batch tiles -> shard across both v7x TensorCores.
            dimension_semantics=("parallel",),
            # Headroom above v5e's 16 MiB default scoped VMEM.
            vmem_limit_bytes=32 * 1024 * 1024,
        ),
    )(xd, w1p, b1p, w2p, b2p)

    # Unpack lane-dense output back to per-row layout (free reshape) and drop
    # any ragged-batch pad rows.
    out = out.reshape(Bp, D_out)
    return out[:B] if Bp != B else out


if __name__ == "__main__":
    key = jax.random.PRNGKey(0)
    kx, k1, kb1, k2, kb2 = jax.random.split(key, 5)

    D_in, H, D_out = 32, 64, 16
    B = 512

    x = jax.random.normal(kx, (B, D_in), dtype=jnp.float32)
    # Deterministic parameter init (synthetic; mimics PyTorch Linear uniform scale).
    w1 = jax.random.uniform(k1, (D_in, H), minval=-1.0, maxval=1.0) / jnp.sqrt(D_in)
    b1 = jax.random.uniform(kb1, (1, H), minval=-1.0, maxval=1.0) / jnp.sqrt(D_in)
    w2 = jax.random.uniform(k2, (H, D_out), minval=-1.0, maxval=1.0) / jnp.sqrt(H)
    b2 = jax.random.uniform(kb2, (1, D_out), minval=-1.0, maxval=1.0) / jnp.sqrt(H)

    # Reference in plain JAX (f32 end-to-end); kernel uses bf16 MXU operands
    # with f32 accumulation, so compare with a bf16-appropriate tolerance.
    ref = jnp.tanh(jnp.maximum(x @ w1 + b1, 0.0) @ w2 + b2)

    # Default f32 output; small tile_rows to exercise a multi-step grid.
    out = jax.block_until_ready(multi_module(x, w1, b1, w2, b2, tile_rows=128))
    assert out.shape == (B, D_out)
    assert jnp.allclose(out, ref, atol=2e-2, rtol=2e-2)

    # Default tile (single/dual block) + bf16 output option (halved writeback).
    out_bf16 = jax.block_until_ready(
        multi_module(x, w1, b1, w2, b2, out_dtype=jnp.bfloat16))
    assert out_bf16.shape == (B, D_out)
    assert jnp.allclose(out_bf16.astype(jnp.float32), ref, atol=2e-2, rtol=2e-2)

    # Ragged batch (pad-to-8 + masked edge handling).
    out_ragged = jax.block_until_ready(multi_module(x[:37], w1, b1, w2, b2))
    assert out_ragged.shape == (37, D_out)
    assert jnp.allclose(out_ragged, ref[:37], atol=2e-2, rtol=2e-2)

    # Tiny batch path (single partial block).
    out_small = jax.block_until_ready(multi_module(x[:5], w1, b1, w2, b2))
    assert out_small.shape == (5, D_out)
    assert jnp.allclose(out_small, ref[:5], atol=2e-2, rtol=2e-2)

    print("KERNEL_OK")
</pallas_src>

<mosaic_0001>
module attributes {stable_mosaic.version = 11 : i64} {
  func.func @multi_module_kernel(%arg0: i32, %arg1: memref<16x256xf32, #tpu.memory_space<vmem>>, %arg2: memref<256x512xbf16, #tpu.memory_space<vmem>>, %arg3: memref<1x512xf32, #tpu.memory_space<vmem>>, %arg4: memref<512x128xbf16, #tpu.memory_space<vmem>>, %arg5: memref<1x128xf32, #tpu.memory_space<vmem>>, %arg6: memref<16x128xf32, #tpu.memory_space<vmem>>) attributes {dimension_semantics = [#tpu.dimension_semantics<parallel>], iteration_bounds = array<i64: 4>, scalar_prefetch = 0 : i64, scratch_operands = 0 : i64, tpu.core_type = #tpu.core_type<tc>, window_params = [{transform_indices = @transform_0, window_bounds = array<i64: 16, 256>}, {pipeline_mode = #tpu.pipeline_mode<synchronous>, transform_indices = @transform_1, window_bounds = array<i64: 256, 512>}, {pipeline_mode = #tpu.pipeline_mode<synchronous>, transform_indices = @transform_2, window_bounds = array<i64: 1, 512>}, {pipeline_mode = #tpu.pipeline_mode<synchronous>, transform_indices = @transform_3, window_bounds = array<i64: 512, 128>}, {pipeline_mode = #tpu.pipeline_mode<synchronous>, transform_indices = @transform_4, window_bounds = array<i64: 1, 128>}, {transform_indices = @transform_5, window_bounds = array<i64: 16, 128>}]} {
    %c0 = arith.constant 0 : index
    %c0_0 = arith.constant 0 : index
    %0 = vector.load %arg1[%c0, %c0_0] : memref<16x256xf32, #tpu.memory_space<vmem>>, vector<16x256xf32>
    %1 = arith.truncf %0 : vector<16x256xf32> to vector<16x256xbf16>
    %c0_1 = arith.constant 0 : index
    %c0_2 = arith.constant 0 : index
    %2 = vector.load %arg2[%c0_1, %c0_2] : memref<256x512xbf16, #tpu.memory_space<vmem>>, vector<256x512xbf16>
    %cst = arith.constant dense<0.000000e+00> : vector<16x512xf32>
    %3 = tpu.matmul %1, %2, %cst {dimension_numbers = #tpu.dot_dimension_numbers<[1], [0], [0], [1], [0, 0, 1, 1], [], []>} : vector<16x256xbf16>, vector<256x512xbf16>, vector<16x512xf32> -> vector<16x512xf32>
    %c0_3 = arith.constant 0 : index
    %c0_4 = arith.constant 0 : index
    %4 = vector.load %arg3[%c0_3, %c0_4] : memref<1x512xf32, #tpu.memory_space<vmem>>, vector<1x512xf32>
    %5 = vector.broadcast %4 : vector<1x512xf32> to vector<16x512xf32>
    %6 = arith.addf %3, %5 : vector<16x512xf32>
    %cst_5 = arith.constant 0.000000e+00 : f32
    %7 = vector.broadcast %cst_5 : f32 to vector<16x512xf32>
    %8 = arith.maximumf %6, %7 : vector<16x512xf32>
    %9 = arith.truncf %8 : vector<16x512xf32> to vector<16x512xbf16>
    %c0_6 = arith.constant 0 : index
    %c0_7 = arith.constant 0 : index
    %10 = vector.load %arg4[%c0_6, %c0_7] : memref<512x128xbf16, #tpu.memory_space<vmem>>, vector<512x128xbf16>
    %cst_8 = arith.constant dense<0.000000e+00> : vector<16x128xf32>
    %11 = tpu.matmul %9, %10, %cst_8 {dimension_numbers = #tpu.dot_dimension_numbers<[1], [0], [0], [1], [0, 0, 1, 1], [], []>} : vector<16x512xbf16>, vector<512x128xbf16>, vector<16x128xf32> -> vector<16x128xf32>
    %c0_9 = arith.constant 0 : index
    %c0_10 = arith.constant 0 : index
    %12 = vector.load %arg5[%c0_9, %c0_10] : memref<1x128xf32, #tpu.memory_space<vmem>>, vector<1x128xf32>
    %13 = vector.broadcast %12 : vector<1x128xf32> to vector<16x128xf32>
    %14 = arith.addf %11, %13 : vector<16x128xf32>
    %15 = math.tanh %14 : vector<16x128xf32>
    %c0_11 = arith.constant 0 : index
    %c0_12 = arith.constant 0 : index
    %16 = vector.load %arg6[%c0_11, %c0_12] : memref<16x128xf32, #tpu.memory_space<vmem>>, vector<16x128xf32>
    tpu.vector_store %arg6[%c0_11, %c0_12], %15 {strides = array<i32>} : memref<16x128xf32, #tpu.memory_space<vmem>>, vector<16x128xf32>,
    return
  }
  func.func @transform_0(%arg0: i32) -> (i32, i32) {
    %c0_i32 = arith.constant 0 : i32
    %c0_i32_0 = arith.constant 0 : i32
    return %arg0, %c0_i32 : i32, i32
  }
  func.func @transform_1(%arg0: i32) -> (i32, i32) {
    %c0_i32 = arith.constant 0 : i32
    %c0_i32_0 = arith.constant 0 : i32
    %c0_i32_1 = arith.constant 0 : i32
    return %c0_i32, %c0_i32_0 : i32, i32
  }
  func.func @transform_2(%arg0: i32) -> (i32, i32) {
    %c0_i32 = arith.constant 0 : i32
    %c0_i32_0 = arith.constant 0 : i32
    %c0_i32_1 = arith.constant 0 : i32
    return %c0_i32, %c0_i32_0 : i32, i32
  }
  func.func @transform_3(%arg0: i32) -> (i32, i32) {
    %c0_i32 = arith.constant 0 : i32
    %c0_i32_0 = arith.constant 0 : i32
    %c0_i32_1 = arith.constant 0 : i32
    return %c0_i32, %c0_i32_0 : i32, i32
  }
  func.func @transform_4(%arg0: i32) -> (i32, i32) {
    %c0_i32 = arith.constant 0 : i32
    %c0_i32_0 = arith.constant 0 : i32
    %c0_i32_1 = arith.constant 0 : i32
    return %c0_i32, %c0_i32_0 : i32, i32
  }
  func.func @transform_5(%arg0: i32) -> (i32, i32) {
    %c0_i32 = arith.constant 0 : i32
    %c0_i32_0 = arith.constant 0 : i32
    return %arg0, %c0_i32 : i32, i32
  }
}

</mosaic_0001>

<bundles_post_ra>
// kernel: tpu_custom_call.1
= control target key start
LH: loop header
LB: loop body
LE: loop exit
PB: predicated region body
PF: predicated region fallthrough
CT: control target
= control target key end

     0   :  { %10 = vsyncpa [#allocation3], 0  ;;  %s2051_s0 = inlined_call_operand.hbm [shape: f32[64,256], index: 0, kind: input, shape index: {}]   ;;  %s2052_s1 = inlined_call_operand.hbm [shape: bf16[256,512], index: 1, kind: input, shape index: {}]   ;;  %s2053_s2 = inlined_call_operand.vmem [shape: f32[1,512], index: 2, kind: input, shape index: {}]   ;;  %s2054_s3 = inlined_call_operand.hbm [shape: bf16[512,128], index: 3, kind: input, shape index: {}]   ;;  %s2055_s4 = inlined_call_operand.vmem [shape: f32[1,128], index: 4, kind: input, shape index: {}]   ;;  %s2056_s5 = inlined_call_operand.hbm [shape: f32[64,128], index: 5, kind: output, shape index: {}]  }
   0x1   :  { %12 = vsyncpa [#allocation3 + $0x1], 0 }
   0x2   :  { %13 = vsyncpa [#allocation6], 0 }
   0x3   :  { %14 = vsyncpa [#allocation4], 0 }
   0x4   :  { %16 = vsyncpa [#allocation4 + $0x1], 0  ;;  %s1807_s18 = smov 0   ;;  %s1809_s19 = smov 0  }
   0x5   :  { %s1811_s20 = smov 0   ;;  %s1813_s21 = smov 0  }
   0x6 LB: > { %s1828_s22 = sadd.s32 4294967295, %s1765_s21   ;;  %s1241_s23 = sadd.s32 4294967294, %s1765_s21   ;;  %s1765_s21 = sphi %s1813_s21, %s2075_s21   ;;  %s1761_s20 = sphi %s1811_s20, %s2074_s20   ;;  %s1757_s19 = sphi %s1809_s19, %s2073_s19   ;;  %s1753_s18 = sphi %s1807_s18, %s2072_s18  }
   0x7   : > { %p42_p0 = scmp.ne.s32.totalorder %s1757_s19, %s1753_s18  ;;  %p2057_p1 = scmp.eq.s32.totalorder %s1828_s22, 0 }
   0x8   : > { %p156_p3 = scmp.eq.s32.totalorder %s1241_s23, 3  ;;  %p1242_p5 = scmp.ge.s32.totalorder %s1765_s21, 1 }
   0x9   : > { %p1837_p4 = por %p2057_p1, %p42_p0  ;;  %p163_p7 = scmp.lt.s32.totalorder %s1765_s21, 5 }
   0xa   : > { %p1842_p6 = por %p156_p3, %p42_p0  ;;  %s1767_s27 = smov [#allocation5]  }
   0xb   : > { %s2060_s24 = scalar_select %p1837_p4, 1, 0 }
   0xc   : > { %s2061_s25 = scalar_select %p1842_p6, 1, 0 }
   0xd   : > { %p1847_p8 = pnand %p1242_p5, %p163_p7  ;;  %s175_s28 = sshll.u32 %s1767_s27, 4  ;;  %s176_s28 = int_to_ptr.vmem [resolvable:$true] %s175_s28 }
   0xe   : > { %s1768_s30 = smov [#allocation7]   ;;  %s1609_s9 = scalar_lea.hbm %s2052_s1, 8192 }
   0xf   : > { %s2062_s26 = scalar_select %p1847_p8, 1, 0 }
  0x10   : > { %p1416_p9 = pneg %p1847_p8  ;;  %s191_s6 = sshll.u32 %s1768_s30, 4  ;;  %s1859_s6 = int_to_ptr.vmem [resolvable:$true] %s191_s6 }
  0x11   : > { %p1610_p11 = scmp.ne.s32.totalorder %s2052_s1, %s1609_s9  ;;  %p1616_p3 = scmp.lt.u32.totalorder %s1609_s9, %s2052_s1 }
  0x12   : > { %p1855_p10 = pnand %p1416_p9, %p2057_p1 }
  0x14   : > { %p1611_p12 = pneg %p1855_p10 }
  0x16   : > { %p1612_p13 = pnand %p1611_p12, %p1610_p11 }
  0x18   : > { %p1613_p0 = pneg %p1612_p13 }
  0x1a   : > { %p1618_p5 = pnand %p1616_p3, %p1613_p0 }
  0x1c   : > { %1621 = shalt.err (!%p1618_p5)
}
  0x1d   : > { %s1622_s14 = scalar_lea.vmem %s176_s28, 8192  ;;  %p1630_p2 = scmp.lt.s32.totalorder %s176_s28, %s176_s28 }
  0x1e   : > { %p1623_p7 = scmp.ne.s32.totalorder %s176_s28, %s1622_s14  ;;  %p1631_p6 = scmp.lt.s32.totalorder %s1622_s14, %s1622_s14 }
  0x20   : > { %p1625_p9 = pnand %p1623_p7, %p1611_p12  ;;  %p1632_p4 = por %p1631_p6, %p1630_p2 }
  0x22   : > { %p1626_p1 = pneg %p1625_p9 }
  0x24   : > { %p1633_p8 = pnand %p1632_p4, %p1626_p1 }
  0x26   : > { %1636 = shalt.err (!%p1633_p8)
}
  0x27   : > { %s1769_s15 = smov 256   ;;  %s1770_s16 = smov 16  }
  0x28   : > { %1419 = dma.hbm_to_vmem [thread:$0]  (!%p1855_p10), %s2052_s1, 8192, %s176_s28, [#allocation6], %s1769_s15, %s1769_s15, %s1770_s16  }
  0x29   : > { %s1637_s7 = scalar_lea.hbm %s2054_s3, 4096 }
  0x2a   : > { %p1638_p1 = scmp.ne.s32.totalorder %s2054_s3, %s1637_s7  ;;  %p1644_p6 = scmp.lt.u32.totalorder %s1637_s7, %s2054_s3 }
  0x2c   : > { %p1640_p2 = pnand %p1638_p1, %p1611_p12 }
  0x2e   : > { %p1641_p4 = pneg %p1640_p2 }
  0x30   : > { %p1646_p8 = pnand %p1644_p6, %p1641_p4 }
  0x32   : > { %1649 = shalt.err (!%p1646_p8)
}
  0x33   : > { %s1650_s28 = scalar_lea.vmem %s1859_s6, 4096  ;;  %p1658_p3 = scmp.lt.s32.totalorder %s1859_s6, %s1859_s6 }
  0x34   : > { %p1651_p11 = scmp.ne.s32.totalorder %s1859_s6, %s1650_s28  ;;  %p1659_p5 = scmp.lt.s32.totalorder %s1650_s28, %s1650_s28 }
  0x36   : > { %p1653_p13 = pnand %p1651_p11, %p1611_p12  ;;  %p1660_p7 = por %p1659_p5, %p1658_p3 }
  0x38   : > { %p1654_p0 = pneg %p1653_p13 }
  0x3a   : > { %p1661_p9 = pnand %p1660_p7, %p1654_p0 }
  0x3c   : > { %1664 = shalt.err (!%p1661_p9)
}
  0x3d   : > { %s1771_s12 = smov 64   ;;  %s1772_s13 = smov 4  }
  0x3e   : > { %1422 = dma.hbm_to_vmem [thread:$0]  (!%p1855_p10), %s2054_s3, 4096, %s1859_s6, [#allocation6], %s1771_s12, %s1771_s12, %s1772_s13  }
  0x3f   : > { %s1912_s23 = sadd.s32 1, %s1765_s21   ;;  %s29_s30 = sadd.s32 1, %s1761_s20 }
  0x40   : > { %s26_s27 = ssub.s32 %s1765_s21, %s1912_s23  ;;  %p36_p1 = scmp.ne.s32.totalorder %s1761_s20, %s1757_s19 }
  0x41   : > { %p27_p12 = scmp.eq.s32.totalorder %s26_s27, 0  ;;  %p37_p2 = scmp.eq.s32.totalorder %s1765_s21, 0 }
  0x42   : > { %p2064_p6 = scmp.eq.s32.totalorder %s1828_s22, 3  ;;  %p1433_p11 = scmp.lt.s32.totalorder %s1765_s21, 4 }
  0x43   : > { %s1921_s7 = scalar_select %p27_p12, %s1761_s20, %s29_s30  }
  0x44   : > { %p38_p4 = por %p37_p2, %p36_p1  ;;  %p1925_p8 = por %p2064_p6, %p36_p1 }
  0x45   : > { %s208_s29 = sand.u32 1, %s1761_s20   ;;  %s1358_s6 = sshll.u32 %s1765_s21, 9 }
  0x46   : > { %s1246_s9 = sshll.u32 %s208_s29, 5  ;;  %s1935_s28 = scalar_lea.hbm %s2051_s0, %s1358_s6 }
  0x47   : > { %s212_s12 = scalar_lea.vmem [#allocation2], %s1246_s9  ;;  %p1939_p10 = pnand %p1433_p11, %p38_p4 }
  0x48   : > { %s220_s13 = sshll.u32 %s212_s12, 4  ;;  %s1943_s17 = scalar_lea.sflag [#allocation3], %s208_s29  ;;  %s1937_s13 = int_to_ptr.vmem [resolvable:$true] %s220_s13 }
  0x49   : > { %s1665_s27 = scalar_lea.hbm %s1935_s28, 512  ;;  %p1667_p0 = pneg %p1939_p10 }
  0x4a   : > { %p1666_p13 = scmp.ne.s32.totalorder %s1935_s28, %s1665_s27  ;;  %s1670_s6 = scalar_lea.hbm %s2051_s0, 2048 }
  0x4b   : > { %p1671_p7 = scmp.lt.u32.totalorder %s1935_s28, %s2051_s0  ;;  %p1672_p9 = scmp.lt.u32.totalorder %s1670_s6, %s1665_s27 }
  0x4c   : > { %p1668_p3 = pnand %p1667_p0, %p1666_p13  ;;  %p1674_p1 = scmp.lt.u32.totalorder %s1665_s27, %s1935_s28 }
  0x4d   : > { %p1673_p12 = por %p1672_p9, %p1671_p7 }
  0x4e   : > { %p1669_p5 = pneg %p1668_p3 }
  0x4f   : > { %p1675_p2 = por %p1674_p1, %p1673_p12 }
  0x51   : > { %p1676_p4 = pnand %p1675_p2, %p1669_p5 }
  0x53   : > { %1679 = shalt.err (!%p1676_p4)
}
  0x54   : > { %s1680_s29 = scalar_lea.vmem %s1937_s13, 512  ;;  %s1773_s12 = smov [#allocation2]  }
  0x55   : > { %p1681_p6 = scmp.ne.s32.totalorder %s1937_s13, %s1680_s29  ;;  %s1685_s30 = sshll.u32 %s1773_s12, 4  ;;  %s1686_s30 = int_to_ptr.vmem [resolvable:$false] %s1685_s30 }
  0x56   : > { %s1687_s9 = scalar_lea.vmem %s1686_s30, 1024  ;;  %p1688_p3 = scmp.lt.s32.totalorder %s1937_s13, %s1686_s30 }
  0x57   : > { %p1683_p11 = pnand %p1681_p6, %p1667_p0  ;;  %p1689_p7 = scmp.lt.s32.totalorder %s1687_s9, %s1680_s29 }
  0x59   : > { %p1684_p13 = pneg %p1683_p11  ;;  %p1690_p9 = por %p1689_p7, %p1688_p3 }
  0x5b   : > { %p1691_p12 = pnand %p1690_p9, %p1684_p13 }
  0x5d   : > { %1694 = shalt.err (!%p1691_p12)
}
  0x5e   : > { %1426 = dma.hbm_to_vmem [thread:$0]  (!%p1939_p10), %s1935_s28, 512, %s1937_s13, %s1943_s17, %s1769_s15, %s1769_s15, %s1770_s16  }
  0x5f   : > { %p2067_p0 = scmp.ne.s32.totalorder %s2062_s26, 0 }
  0x60   : > { %s1977_s27 = sand.u32 (!%p2067_p0), 1, %s1757_s19   ;;  %p2068_p5 = scmp.ne.s32.totalorder (!%p2067_p0), %s2060_s24, 0 }
  0x61   : > { %232 = sbr.rel (%p2067_p0) target bundleno = 642 (0x282), region = 40  ;;  %s1251_s6 = sshll.u32 (!%p2067_p0), %s1977_s27, 5 }
  0x62   : > { %s235_s10 = scalar_lea.sflag (!%p2067_p0), [#allocation3], %s1977_s27  ;;  %s1981_s11 = scalar_lea.vmem (!%p2067_p0), [#allocation2], %s1251_s6 }
  0x68   : > { %1740 = dma.done.wait (%p2068_p5), %s235_s10, 512  }
  0x69   : > { %1742 = vsyncadd (%p2068_p5), %s235_s10, 4294966784  ;;  %p2069_p10 = scmp.eq.s32.totalorder %s1828_s22, 0 }
  0x6b   : > { %1744 = dma.done.wait (%p2069_p10), [#allocation6], 12288   ;;  %p2070_p1 = pmov %p2069_p10 }
  0x6c   : > { %v1477_v0 = vld [vmem:[#allocation5 + $0x4] ss:$16 sps:$4 sm:$0xff]   ;;  %v1479_v1 = vld [vmem:[#allocation5 + $0xc] ss:$16 sps:$4 sm:$0xff]   ;;  %v1481_v2 = vld [vmem:[#allocation5] ss:$16 sps:$4 sm:$0xff]  }
  0x6d   : > { %1746 = vsyncadd (%p2070_p1), [#allocation6], 4294955008  ;;  %688 = vmatprep.subr.bf16.mxu0 %v1477_v0  ;;  %v1482_v3 = vld [vmem:[#allocation5 + $0x8] ss:$16 sps:$4 sm:$0xff]   ;;  %731 = vmatprep.subr.bf16.mxu1 %v1479_v1  ;;  %v1483_v4 = vld [vmem:[#allocation5 + $0x24] ss:$16 sps:$4 sm:$0xff]  }
  0x6e   : > { %689 = vmatpush1.bf16.msra.mxu0 %v1481_v2  ;;  %732 = vmatpush1.bf16.msra.mxu1 %v1482_v3  ;;  %v1485_v5 = vld [vmem:[#allocation5 + $0x2c] ss:$16 sps:$4 sm:$0xff]   ;;  %v1487_v6 = vld [vmem:[#allocation5 + $0x20] ss:$16 sps:$4 sm:$0xff]   ;;  %v1488_v7 = vld [vmem:[#allocation5 + $0x28] ss:$16 sps:$4 sm:$0xff]  }
  0x6f   : > { %690 = vmatprep.subr.bf16.mxu0 %v1483_v4  ;;  %733 = vmatprep.subr.bf16.mxu1 %v1485_v5  ;;  %v1489_v8 = vld [vmem:[#allocation5 + $0x44] ss:$16 sps:$4 sm:$0xff]   ;;  %v1491_v9 = vld [vmem:[#allocation5 + $0x4c] ss:$16 sps:$4 sm:$0xff]   ;;  %v1493_v10 = vld [vmem:[#allocation5 + $0x40] ss:$16 sps:$4 sm:$0xff]  }
  0x70   : > { %v1494_v11 = vld [vmem:[#allocation5 + $0x48] ss:$16 sps:$4 sm:$0xff]   ;;  %v1495_v12 = vld [vmem:[#allocation5 + $0x64] ss:$16 sps:$4 sm:$0xff]   ;;  %v1497_v13 = vld [vmem:[#allocation5 + $0x6c] ss:$16 sps:$4 sm:$0xff]  }
  0x71   : > { %v1499_v14 = vld [vmem:[#allocation5 + $0x60] ss:$16 sps:$4 sm:$0xff]   ;;  %v1500_v15 = vld [vmem:[#allocation5 + $0x68] ss:$16 sps:$4 sm:$0xff]   ;;  %v1501_v16 = vld [vmem:[#allocation5 + $0x84] ss:$16 sps:$4 sm:$0xff]  }
  0x72   : > { %691 = vmatpush1.bf16.msra.mxu0 %v1487_v6  ;;  %734 = vmatpush1.bf16.msra.mxu1 %v1488_v7  ;;  %v1503_v17 = vld [vmem:[#allocation5 + $0x8c] ss:$16 sps:$4 sm:$0xff]   ;;  %v1505_v18 = vld [vmem:[#allocation5 + $0x80] ss:$16 sps:$4 sm:$0xff]   ;;  %v1506_v19 = vld [vmem:[#allocation5 + $0x88] ss:$16 sps:$4 sm:$0xff]  }
  0x73   : > { %692 = vmatprep.subr.bf16.mxu0 %v1489_v8  ;;  %735 = vmatprep.subr.bf16.mxu1 %v1491_v9  ;;  %v1507_v20 = vld [vmem:[#allocation5 + $0xa4] ss:$16 sps:$4 sm:$0xff]   ;;  %v1509_v21 = vld [vmem:[#allocation5 + $0xac] ss:$16 sps:$4 sm:$0xff]   ;;  %v1511_v22 = vld [vmem:[#allocation5 + $0xa0] ss:$16 sps:$4 sm:$0xff]  }
  0x74   : > { %v1512_v23 = vld [vmem:[#allocation5 + $0xa8] ss:$16 sps:$4 sm:$0xff]   ;;  %v1513_v24 = vld [vmem:[#allocation5 + $0xc4] ss:$16 sps:$4 sm:$0xff]   ;;  %v1515_v25 = vld [vmem:[#allocation5 + $0xcc] ss:$16 sps:$4 sm:$0xff]  }
  0x75   : > { %v1517_v26 = vld [vmem:[#allocation5 + $0xc0] ss:$16 sps:$4 sm:$0xff]   ;;  %v1518_v27 = vld [vmem:[#allocation5 + $0xc8] ss:$16 sps:$4 sm:$0xff]   ;;  %v1519_v28 = vld [vmem:[#allocation5 + $0xe4] ss:$16 sps:$4 sm:$0xff]  }
  0x76   : > { %693 = vmatpush1.bf16.msra.mxu0 %v1493_v10  ;;  %736 = vmatpush1.bf16.msra.mxu1 %v1494_v11  ;;  %v1521_v29 = vld [vmem:[#allocation5 + $0xec] ss:$16 sps:$4 sm:$0xff]   ;;  %v1523_v30 = vld [vmem:[#allocation5 + $0xe0] ss:$16 sps:$4 sm:$0xff]   ;;  %v1524_v31 = vld [vmem:[#allocation5 + $0xe8] ss:$16 sps:$4 sm:$0xff]  }
  0x77   : > { %694 = vmatprep.subr.bf16.mxu0 %v1495_v12  ;;  %737 = vmatprep.subr.bf16.mxu1 %v1497_v13  ;;  %v1525_v32 = vld [vmem:[#allocation5 + $0x104] ss:$16 sps:$4 sm:$0xff]   ;;  %v1527_v33 = vld [vmem:[#allocation5 + $0x10c] ss:$16 sps:$4 sm:$0xff]   ;;  %v1529_v34 = vld [vmem:[#allocation5 + $0x100] ss:$16 sps:$4 sm:$0xff]  }
  0x78   : > { %v1530_v35 = vld [vmem:[#allocation5 + $0x108] ss:$16 sps:$4 sm:$0xff]   ;;  %v1531_v36 = vld [vmem:[#allocation5 + $0x124] ss:$16 sps:$4 sm:$0xff]   ;;  %v1533_v37 = vld [vmem:[#allocation5 + $0x12c] ss:$16 sps:$4 sm:$0xff]  }
  0x79   : > { %v1535_v38 = vld [vmem:[#allocation5 + $0x120] ss:$16 sps:$4 sm:$0xff]   ;;  %v1536_v39 = vld [vmem:[#allocation5 + $0x128] ss:$16 sps:$4 sm:$0xff]   ;;  %v1537_v40 = vld [vmem:[#allocation5 + $0x144] ss:$16 sps:$4 sm:$0xff]  }
  0x7a   : > { %695 = vmatpush1.bf16.msra.mxu0 %v1499_v14  ;;  %738 = vmatpush1.bf16.msra.mxu1 %v1500_v15  ;;  %v1539_v41 = vld [vmem:[#allocation5 + $0x14c] ss:$16 sps:$4 sm:$0xff]   ;;  %v1541_v42 = vld [vmem:[#allocation5 + $0x140] ss:$16 sps:$4 sm:$0xff]   ;;  %v1542_v43 = vld [vmem:[#allocation5 + $0x148] ss:$16 sps:$4 sm:$0xff]  }
  0x7b   : > { %696 = vmatprep.subr.bf16.mxu0 %v1501_v16  ;;  %739 = vmatprep.subr.bf16.mxu1 %v1503_v17  ;;  %v1543_v44 = vld [vmem:[#allocation5 + $0x164] ss:$16 sps:$4 sm:$0xff]   ;;  %v1545_v45 = vld [vmem:[#allocation5 + $0x16c] ss:$16 sps:$4 sm:$0xff]   ;;  %v1547_v47 = vld [vmem:[#allocation5 + $0x160] ss:$16 sps:$4 sm:$0xff]  }
  0x7c   : > { %v277_v46 = vld [vmem:[%s1981_s11 + $0x8] sm:$0xff]  ;;  %v279_v49 = vld [vmem:[%s1981_s11 + $0x18] sm:$0xff]  ;;  %v1549_v50 = vld [vmem:[#allocation5 + $0x184] ss:$16 sps:$4 sm:$0xff]   ;;  %s1254_s28 = sshll.u32 %s1977_s27, 4  ;;  %s1359_s13 = sshll.u32 %s1828_s22, 8 }
  0x7d   : > { %v1548_v48 = vld [vmem:[#allocation5 + $0x168] ss:$16 sps:$4 sm:$0xff]   ;;  %v281_v51 = vpack.c.bf16 %v279_v49, %v277_v46  ;;  %v1551_v52 = vld [vmem:[#allocation5 + $0x18c] ss:$16 sps:$4 sm:$0xff]   ;;  %v1553_v53 = vld [vmem:[#allocation5 + $0x180] ss:$16 sps:$4 sm:$0xff]   ;;  %s2006_s30 = scalar_lea.hbm %s2056_s5, %s1359_s13 }
  0x7e   : > { %697 = vmatpush1.bf16.msra.mxu0 %v1505_v18  ;;  %740 = vmatpush1.bf16.msra.mxu1 %v1506_v19  ;;  %v1554_v54 = vld [vmem:[#allocation5 + $0x188] ss:$16 sps:$4 sm:$0xff]   ;;  %v1555_v55 = vld [vmem:[#allocation5 + $0x1a4] ss:$16 sps:$4 sm:$0xff]   ;;  %v1557_v56 = vld [vmem:[#allocation5 + $0x1ac] ss:$16 sps:$4 sm:$0xff]  }
  0x7f   : > { %698 = vmatprep.subr.bf16.mxu0 %v1507_v20  ;;  %741 = vmatprep.subr.bf16.mxu1 %v1509_v21  ;;  %v1559_v57 = vld [vmem:[#allocation5 + $0x1a0] ss:$16 sps:$4 sm:$0xff]   ;;  %v1560_v58 = vld [vmem:[#allocation5 + $0x1a8] ss:$16 sps:$4 sm:$0xff]   ;;  %v1561_v59 = vld [vmem:[#allocation5 + $0x1c4] ss:$16 sps:$4 sm:$0xff]  }
  0x80   : > { %720 = vmatprep.mubr.bf16.mxu0 %v281_v51  ;;  %763 = vmatprep.mubr.bf16.mxu1 %v281_v51  ;;  %v1563_v60 = vld [vmem:[#allocation5 + $0x1cc] ss:$16 sps:$4 sm:$0xff]   ;;  %v1565_v61 = vld [vmem:[#allocation5 + $0x1c0] ss:$16 sps:$4 sm:$0xff]   ;;  %v1566_v62 = vld [vmem:[#allocation5 + $0x1c8] ss:$16 sps:$4 sm:$0xff]  }
  0x81   : > { %v1567_v63 = vld [vmem:[#allocation5 + $0x1e4] ss:$16 sps:$4 sm:$0xff]   ;;  %v1569_v0 = vld [vmem:[#allocation5 + $0x1ec] ss:$16 sps:$4 sm:$0xff]   ;;  %v1571_v1 = vld [vmem:[#allocation5 + $0x1e0] ss:$16 sps:$4 sm:$0xff]  }
  0x82   : > { %699 = vmatpush1.bf16.msra.mxu0 %v1511_v22  ;;  %742 = vmatpush1.bf16.msra.mxu1 %v1512_v23  ;;  %v1572_v2 = vld [vmem:[#allocation5 + $0x1e8] ss:$16 sps:$4 sm:$0xff]   ;;  %v276_v3 = vld [vmem:[%s1981_s11] sm:$0xff]  ;;  %v278_v4 = vld [vmem:[%s1981_s11 + $0x10] sm:$0xff]  ;;  %s272_s14 = scalar_lea.vmem [#allocation8], %s1254_s28  ;;  %s1136_s9 = scalar_lea.sflag [#allocation4], %s1977_s27 }
  0x83   : > { %700 = vmatprep.subr.bf16.mxu0 %v1513_v24  ;;  %743 = vmatprep.subr.bf16.mxu1 %v1515_v25  ;;  %v1573_v5 = vld [vmem:[#allocation7 + $0x40] sm:$0xff]   ;;  %v280_v8 = vpack.c.bf16 %v278_v4, %v276_v3  ;;  %v1577_v10 = vld [vmem:[#allocation7 + $0x48] sm:$0xff]   ;;  %v1581_v14 = vld [vmem:[#allocation7 + $0x50] sm:$0xff]   ;;  %s1149_s17 = sshll.u32 %s272_s14, 4  ;;  %s1774_s22 = smov [#allocation8]   ;;  %s2008_s17 = int_to_ptr.vmem [resolvable:$true] %s1149_s17 }
  0x84   : > { %v1574_v6 = vld [vmem:[#allocation7 + $0xc0] sm:$0xff]   ;;  %v1578_v11 = vld [vmem:[#allocation7 + $0xc8] sm:$0xff]   ;;  %v1582_v15 = vld [vmem:[#allocation7 + $0xd0] sm:$0xff]   ;;  %s1695_s6 = scalar_lea.vmem %s2008_s17, 256  ;;  %s1699_s10 = sshll.u32 %s1774_s22, 4  ;;  %s1700_s10 = int_to_ptr.vmem [resolvable:$false] %s1699_s10 }
  0x85   : > { %v1575_v7 = vld [vmem:[#allocation7] sm:$0xff]   ;;  %v1579_v12 = vld [vmem:[#allocation7 + $0x8] sm:$0xff]   ;;  %v1583_v16 = vld [vmem:[#allocation7 + $0x10] sm:$0xff]   ;;  %p1696_p2 = scmp.ne.s32.totalorder %s2008_s17, %s1695_s6  ;;  %s1701_s11 = scalar_lea.vmem %s1700_s10, 512 }
  0x86   : > { %701 = vmatpush1.bf16.msra.mxu0 %v1517_v26  ;;  %744 = vmatpush1.bf16.msra.mxu1 %v1518_v27  ;;  %v1576_v9 = vld [vmem:[#allocation7 + $0x80] sm:$0xff]   ;;  %v1580_v13 = vld [vmem:[#allocation7 + $0x88] sm:$0xff]   ;;  %v1584_v17 = vld [vmem:[#allocation7 + $0x90] sm:$0xff]   ;;  %p1702_p11 = scmp.lt.s32.totalorder %s2008_s17, %s1700_s10  ;;  %p1703_p13 = scmp.lt.s32.totalorder %s1701_s11, %s1695_s6 }
  0x87   : > { %702 = vmatprep.subr.bf16.mxu0 %v1519_v28  ;;  %745 = vmatprep.subr.bf16.mxu1 %v1521_v29  ;;  %v1585_v18 = vld [vmem:[#allocation7 + $0x58] sm:$0xff]   ;;  %v1589_v22 = vld [vmem:[#allocation7 + $0x60] sm:$0xff]   ;;  %v1593_v26 = vld [vmem:[#allocation7 + $0x68] sm:$0xff]   ;;  %p1697_p4 = pnand %p1696_p2, %p1925_p8 }
  0x88   : > { %v1586_v19 = vld [vmem:[#allocation7 + $0xd8] sm:$0xff]   ;;  %v1590_v23 = vld [vmem:[#allocation7 + $0xe0] sm:$0xff]   ;;  %v1594_v27 = vld [vmem:[#allocation7 + $0xe8] sm:$0xff]   ;;  %p1704_p3 = por %p1703_p13, %p1702_p11 }
  0x89   : > { %v1587_v20 = vld [vmem:[#allocation7 + $0x18] sm:$0xff]   ;;  %v1591_v24 = vld [vmem:[#allocation7 + $0x20] sm:$0xff]   ;;  %v1595_v28 = vld [vmem:[#allocation7 + $0x28] sm:$0xff]   ;;  %p1698_p6 = pneg %p1697_p4 }
  0x8a   : > { %703 = vmatpush1.bf16.msra.mxu0 %v1523_v30  ;;  %746 = vmatpush1.bf16.msra.mxu1 %v1524_v31  ;;  %v1588_v21 = vld [vmem:[#allocation7 + $0x98] sm:$0xff]   ;;  %v1592_v25 = vld [vmem:[#allocation7 + $0xa0] sm:$0xff]   ;;  %v1596_v29 = vld [vmem:[#allocation7 + $0xa8] sm:$0xff]  }
  0x8b   : > { %704 = vmatprep.subr.bf16.mxu0 %v1525_v32  ;;  %747 = vmatprep.subr.bf16.mxu1 %v1527_v33  ;;  %v1597_v30 = vld [vmem:[#allocation7 + $0x70] sm:$0xff]   ;;  %p1705_p7 = pnand %p1704_p3, %p1698_p6 }
  0x8c   : > { %v1598_v31 = vld [vmem:[#allocation7 + $0xf0] sm:$0xff]  }
  0x8d   : > { %v1599_v32 = vld [vmem:[#allocation7 + $0x30] sm:$0xff]  }
  0x8e   : > { %705 = vmatpush1.bf16.msra.mxu0 %v1529_v34  ;;  %748 = vmatpush1.bf16.msra.mxu1 %v1530_v35  ;;  %v1600_v33 = vld [vmem:[#allocation7 + $0xb0] sm:$0xff]   ;;  %v1601_v34 = vld [vmem:[#allocation7 + $0x78] sm:$0xff]  }
  0x8f   : > { %706 = vmatprep.subr.bf16.mxu0 %v1531_v36  ;;  %749 = vmatprep.subr.bf16.mxu1 %v1533_v37  ;;  %v1602_v35 = vld [vmem:[#allocation7 + $0xf8] sm:$0xff]  }
  0x90   : > { %v1603_v36 = vld [vmem:[#allocation7 + $0x38] sm:$0xff]  }
  0x91   : > { %v1604_v37 = vld [vmem:[#allocation7 + $0xb8] sm:$0xff]  }
  0x92   : > { %707 = vmatpush1.bf16.msra.mxu0 %v1535_v38  ;;  %750 = vmatpush1.bf16.msra.mxu1 %v1536_v39  ;;  %v348_v38 = vlaneseq }
  0x93   : > { %708 = vmatprep.subr.bf16.mxu0 %v1537_v40  ;;  %751 = vmatprep.subr.bf16.mxu1 %v1539_v41 }
  0x94   : > { %v349_v39 = vshrl.u32 %v348_v38, 7 }
  0x96   : > { %709 = vmatpush1.bf16.msra.mxu0 %v1541_v42  ;;  %752 = vmatpush1.bf16.msra.mxu1 %v1542_v43  ;;  %v350_v40 = vsub.s32 0, %v349_v39  ;;  %v358_v41 = vsub.s32 2, %v349_v39  ;;  %v346_v42 = vld [vmem:[%s2053_s2] sm:$0xf]  ;;  %v354_v43 = vsub.s32 1, %v349_v39 }
  0x97   : > { %710 = vmatprep.subr.bf16.mxu0 %v1543_v44  ;;  %753 = vmatprep.subr.bf16.mxu1 %v1545_v45  ;;  %v362_v44 = vsub.s32 3, %v349_v39 }
  0x98   : > { %v351_v45 = vrot.slane %v346_v42, %v350_v40  ;;  %v359_v46 = vrot.slane %v346_v42, %v358_v41 }
  0x9a   : > { %711 = vmatpush1.bf16.msra.mxu0 %v1547_v47  ;;  %754 = vmatpush1.bf16.msra.mxu1 %v1548_v48  ;;  %v355_v47 = vrot.slane %v346_v42, %v354_v43  ;;  %v363_v48 = vrot.slane %v346_v42, %v362_v44 }
  0x9b   : > { %712 = vmatprep.subr.bf16.mxu0 %v1549_v50  ;;  %755 = vmatprep.subr.bf16.mxu1 %v1551_v52 }
  0x9e   : > { %713 = vmatpush1.bf16.msra.mxu0 %v1553_v53  ;;  %756 = vmatpush1.bf16.msra.mxu1 %v1554_v54 }
  0x9f   : > { %714 = vmatprep.subr.bf16.mxu0 %v1555_v55  ;;  %757 = vmatprep.subr.bf16.mxu1 %v1557_v56 }
  0xa2   : > { %715 = vmatpush1.bf16.msra.mxu0 %v1559_v57  ;;  %758 = vmatpush1.bf16.msra.mxu1 %v1560_v58 }
  0xa3   : > { %716 = vmatprep.subr.bf16.mxu0 %v1561_v59  ;;  %759 = vmatprep.subr.bf16.mxu1 %v1563_v60 }
  0xa6   : > { %717 = vmatpush1.bf16.msra.mxu0 %v1565_v61  ;;  %760 = vmatpush1.bf16.msra.mxu1 %v1566_v62 }
  0xa7   : > { %718 = vmatprep.subr.bf16.mxu0 %v1567_v63  ;;  %761 = vmatprep.subr.bf16.mxu1 %v1569_v0 }
  0xaa   : > { %719 = vmatpush1.bf16.msra.mxu0 %v1571_v1  ;;  %762 = vmatpush1.bf16.msra.mxu1 %v1572_v2 }
  0xab   : > { %1360 = vmatprep.subr.bf16.mxu0 %v1573_v5  ;;  %1382 = vmatprep.subr.bf16.mxu1 %v1574_v6 }
  0xad   : > { %721 = vmatmul.mubr.bf16.vlgmr.msra.gmra.mrb[0].mxu0 %v280_v8  ;;  %764 = vmatmul.mubr.bf16.vlgmr.msra.gmra.mrb[0].mxu1 %v280_v8 }
  0xae   : > { %1361 = vmatpush3.bf16.msra.mxu0 %v1575_v7  ;;  %1383 = vmatpush3.bf16.msra.mxu1 %v1576_v9 }
  0xaf   : > { %1362 = vmatprep.subr.bf16.mxu0 %v1577_v10  ;;  %1384 = vmatprep.subr.bf16.mxu1 %v1578_v11 }
  0xb2   : > { %1363 = vmatpush3.bf16.msra.mxu0 %v1579_v12  ;;  %1385 = vmatpush3.bf16.msra.mxu1 %v1580_v13 }
  0xb3   : > { %1364 = vmatprep.subr.bf16.mxu0 %v1581_v14  ;;  %1386 = vmatprep.subr.bf16.mxu1 %v1582_v15  ;;  %v1319_v15 = vld [vmem:[%s2055_s4] ss:$0 sm:$0xff] }
  0xb6   : > { %1365 = vmatpush3.bf16.msra.mxu0 %v1583_v16  ;;  %1387 = vmatpush3.bf16.msra.mxu1 %v1584_v17 }
  0xb7   : > { %1366 = vmatprep.subr.bf16.mxu0 %v1585_v18  ;;  %1388 = vmatprep.subr.bf16.mxu1 %v1586_v19 }
  0xba   : > { %1367 = vmatpush3.bf16.msra.mxu0 %v1587_v20  ;;  %1389 = vmatpush3.bf16.msra.mxu1 %v1588_v21 }
  0xbb   : > { %1368 = vmatprep.subr.bf16.mxu0 %v1589_v22  ;;  %1390 = vmatprep.subr.bf16.mxu1 %v1590_v23 }
  0xbe   : > { %1369 = vmatpush3.bf16.msra.mxu0 %v1591_v24  ;;  %1391 = vmatpush3.bf16.msra.mxu1 %v1592_v25 }
  0xbf   : > { %1370 = vmatprep.subr.bf16.mxu0 %v1593_v26  ;;  %1392 = vmatprep.subr.bf16.mxu1 %v1594_v27 }
  0xc2   : > { %1371 = vmatpush3.bf16.msra.mxu0 %v1595_v28  ;;  %1393 = vmatpush3.bf16.msra.mxu1 %v1596_v29 }
  0xc3   : > { %1372 = vmatprep.subr.bf16.mxu0 %v1597_v30  ;;  %1394 = vmatprep.subr.bf16.mxu1 %v1598_v31 }
  0xc6   : > { %1373 = vmatpush3.bf16.msra.mxu0 %v1599_v32  ;;  %1395 = vmatpush3.bf16.msra.mxu1 %v1600_v33 }
  0xc7   : > { %1374 = vmatprep.subr.bf16.mxu0 %v1601_v34  ;;  %1396 = vmatprep.subr.bf16.mxu1 %v1602_v35 }
  0xca   : > { %1375 = vmatpush3.bf16.msra.mxu0 %v1603_v36  ;;  %1397 = vmatpush3.bf16.msra.mxu1 %v1604_v37 }
 0x180   : > { %v722_v49 = vpop.f32.mrb[0].mxu0  ;;  %v765_v50 = vpop.f32.mrb[0].mxu1 }
 0x181   : > { %v723_v51 = vadd.f32 %v722_v49, %v351_v45  ;;  %v766_v52 = vadd.f32 %v765_v50, %v359_v46  ;;  %v724_v53 = vpop.f32.mrb[1].mxu0  ;;  %v767_v54 = vpop.f32.mrb[1].mxu1 }
 0x182   : > { %v725_v55 = vadd.f32 %v724_v53, %v355_v47  ;;  %v768_v56 = vadd.f32 %v767_v54, %v363_v48  ;;  %v726_v57 = vpop.f32.mrb[2].mxu0  ;;  %v769_v58 = vpop.f32.mrb[2].mxu1 }
 0x183   : > { %v776_v59 = vmax.f32 %v766_v52, 0.0  ;;  %v727_v60 = vadd.f32 %v726_v57, %v351_v45  ;;  %v770_v61 = vadd.f32 %v769_v58, %v359_v46  ;;  %v728_v62 = vpop.f32.mrb[3].mxu0  ;;  %v771_v63 = vpop.f32.mrb[3].mxu1  ;;  %v774_v3 = vmax.f32 %v723_v51, 0.0 }
 0x184   : > { %v777_v0 = vmax.f32 %v768_v56, 0.0  ;;  %v729_v1 = vadd.f32 %v728_v62, %v355_v47  ;;  %v772_v2 = vadd.f32 %v771_v63, %v363_v48  ;;  %v775_v6 = vmax.f32 %v725_v55, 0.0 }
 0x185   : > { %v778_v4 = vmax.f32 %v727_v60, 0.0  ;;  %v780_v5 = vmax.f32 %v770_v61, 0.0 }
 0x186   : > { %v779_v7 = vmax.f32 %v729_v1, 0.0  ;;  %v781_v8 = vmax.f32 %v772_v2, 0.0 }
 0x187   : > { %v782_v9 = vpack.c.bf16 %v778_v4, %v774_v3  ;;  %v784_v10 = vpack.c.bf16 %v780_v5, %v776_v59 }
 0x188   : > { %v783_v11 = vpack.c.bf16 %v779_v7, %v775_v6  ;;  %v785_v12 = vpack.c.bf16 %v781_v8, %v777_v0 }
 0x18a   : > { %1081 = vmatprep.mubr.bf16.mxu0 %v783_v11  ;;  %1122 = vmatprep.mubr.bf16.mxu1 %v785_v12 }
 0x18b   : > { %1082 = vmatmul.mubr.bf16.vlgmr.msra.gmra.mrb[4].mxu0 %v782_v9  ;;  %1123 = vmatmul.mubr.bf16.vlgmr.msra.gmra.mrb[4].mxu1 %v784_v10 }
 0x25e   : > { %v1376_v13 = vpop.f32.mrb[4].mxu0  ;;  %v1398_v14 = vpop.f32.mrb[4].mxu1 }
 0x25f   : > { %v1377_v16 = vpop.f32.mrb[5].mxu0  ;;  %v1399_v17 = vpop.f32.mrb[5].mxu1 }
 0x260   : > { %v1378_v18 = vadd.f32 %v1377_v16, %v1376_v13  ;;  %v1400_v19 = vadd.f32 %v1399_v17, %v1398_v14  ;;  %v1379_v20 = vpop.f32.mrb[6].mxu0  ;;  %v1401_v21 = vpop.f32.mrb[6].mxu1 }
 0x261   : > { %v1380_v22 = vpop.f32.mrb[7].mxu0  ;;  %v1402_v23 = vpop.f32.mrb[7].mxu1 }
 0x262   : > { %v1084_v24 = vadd.f32 %v1378_v18, %v1319_v15  ;;  %v1381_v25 = vadd.f32 %v1380_v22, %v1379_v20  ;;  %v1403_v26 = vadd.f32 %v1402_v23, %v1401_v21 }
 0x264   : > { %v1125_v27 = vadd.f32 %v1400_v19, %v1084_v24  ;;  %v1087_v28 = vadd.f32 %v1381_v25, %v1319_v15 }
 0x266   : > { %1605 = vtanh.f32 %v1125_v27  ;;  %v1128_v29 = vadd.f32 %v1403_v26, %v1087_v28 }
 0x268   : > { %1607 = vtanh.f32 %v1128_v29 }
 0x270   : > { %v1606_v30 = vpop.eup %1605 }
 0x271   : > { %1133 = vst [vmem:[%s272_s14] sm:$0xff] %v1606_v30 }
 0x272   : > { %v1608_v31 = vpop.eup %1607 }
 0x273   : > { %1134 = vst [vmem:[%s272_s14 + $0x8] sm:$0xff] %v1608_v31 }
 0x274   : > { %1708 = shalt.err (!%p1705_p7)
}
 0x275   : > { %s1709_s24 = scalar_lea.hbm %s2006_s30, 256  ;;  %s1713_s16 = scalar_lea.hbm %s2056_s5, 1024 }
 0x276   : > { %p1710_p9 = scmp.ne.s32.totalorder %s2006_s30, %s1709_s24  ;;  %p1714_p5 = scmp.lt.u32.totalorder %s2006_s30, %s2056_s5 }
 0x277   : > { %p1715_p10 = scmp.lt.u32.totalorder %s1713_s16, %s1709_s24  ;;  %p1717_p2 = scmp.lt.u32.totalorder %s1709_s24, %s2006_s30 }
 0x278   : > { %p1711_p12 = pnand %p1710_p9, %p1925_p8 }
 0x279   : > { %p1716_p1 = por %p1715_p10, %p1714_p5 }
 0x27a   : > { %p1712_p0 = pneg %p1711_p12 }
 0x27b   : > { %p1718_p4 = por %p1717_p2, %p1716_p1 }
 0x27d   : > { %p1719_p6 = pnand %p1718_p4, %p1712_p0 }
 0x27f   : > { %1722 = shalt.err (!%p1719_p6)
}
 0x280   : > { %s1775_s14 = smov 128   ;;  %s1776_s29 = smov 8  }
 0x281   : > { %1414 = dma.vmem_to_hbm [thread:$0]  (%p1925_p8), %s2008_s17, 256, %s2006_s30, %s1136_s9, %s1775_s14, %s1775_s14, %s1776_s29  }
 0x282 PF: > { %p1436_p11 = scmp.ge.s32.totalorder %s1765_s21, 2  ;;  %s1164_s12 = sand.u32 1, %s1753_s18  }
 0x283   : > { %p2071_p13 = scmp.ne.s32.totalorder %s2061_s25, 0  ;;  %s1165_s6 = scalar_lea.sflag [#allocation4], %s1164_s12 }
 0x285   : > { %p1428_p3 = pnand %p1436_p11, %p2071_p13 }
 0x287   : > { %1748 = dma.done.wait (!%p1428_p3), %s1165_s6, 256  }
 0x288   : > { %1750 = vsyncadd (!%p1428_p3), %s1165_s6, 4294967040  ;;  %p19_p7 = scmp.ge.s32.totalorder %s1912_s23, 6   ;;  %s2072_s18 = smov %s1757_s19 }
 0x289   : > { %s2073_s19 = smov %s1761_s20  ;;  %s2074_s20 = smov %s1921_s7 }
 0x28a   : > { %s2075_s21 = smov %s1912_s23  ;;  %21 = sbr.rel (!%p19_p7) target bundleno = 6 (0x6), region = 93 }
 0x291   :  { %1170 = vsyncpa [#allocation3], 1 }
 0x292   :  { %1172 = vsyncpa [#allocation3 + $0x1], 1 }
 0x293   :  { %1173 = vsyncpa [#allocation6], 1 }
 0x294   :  { %1174 = vsyncpa [#allocation4], 1 }
 0x295   :  { %1176 = vsyncpa [#allocation4 + $0x1], 1 }

</bundles_post_ra>
